<compile_context>
chip_gen: v5e
topology: v5e:2x2
jax: 0.10.0
libtpu: 0.0.40
codegen_flags: <defaults>
</compile_context>

<pallas_src>
import math
import functools

import jax
import jax.numpy as jnp
import numpy as np
from jax.experimental import pallas as pl
from jax.experimental.pallas import tpu as pltpu


# ----------------------------------------------------------------------------
# helpers
# ----------------------------------------------------------------------------

_VMEM_LIMIT = 32 * 1024 * 1024   # safe on v5e/v6e/v7x (raises v5e's 16 MiB default)


def _cparams(sem):
    return pltpu.CompilerParams(dimension_semantics=sem,
                                vmem_limit_bytes=_VMEM_LIMIT)


def _row_tile(M, cap=512):
    """Largest row tile (multiple of 8, power of two, capped) dividing M."""
    for t in (512, 256, 128, 64, 32, 16, 8):
        if t <= cap and t <= M and M % t == 0:
            return t
    return M


def _col_tile(N, cap=1024):
    """Largest 128-aligned column tile dividing N (falls back to full N)."""
    for t in (1024, 512, 256, 128):
        if t <= cap and N % t == 0:
            return t
    return N


# ----------------------------------------------------------------------------
# Kernel 1: fused QKV projection (one matmul instead of three), bias folded in.
# bf16 operands, f32 accumulation, bf16 output. Tiled over rows and columns.
# ----------------------------------------------------------------------------

def _qkv_proj_kernel(x_ref, w_ref, b_ref, o_ref):
    acc = jnp.dot(x_ref[...], w_ref[...], preferred_element_type=jnp.float32)
    o_ref[...] = (acc + b_ref[...]).astype(o_ref.dtype)


def qkv_projection(x2d, wqkv, bqkv):
    M, D = x2d.shape
    N = wqkv.shape[1]
    tm = _row_tile(M)
    tn = _col_tile(N)
    return pl.pallas_call(
        _qkv_proj_kernel,
        out_shape=jax.ShapeDtypeStruct((M, N), jnp.bfloat16),
        grid=(M // tm, N // tn),
        in_specs=[
            pl.BlockSpec((tm, D), lambda i, j: (i, 0)),
            pl.BlockSpec((D, tn), lambda i, j: (0, j)),
            pl.BlockSpec((1, tn), lambda i, j: (0, j)),
        ],
        out_specs=pl.BlockSpec((tm, tn), lambda i, j: (i, j)),
        compiler_params=_cparams(("parallel", "parallel")),
    )(x2d, wqkv, bqkv)


# ----------------------------------------------------------------------------
# Kernel 2: attention core + output projection + residual + LayerNorm.
# Grid (batch, q-tile); all heads of a batch element handled in one batched
# contraction (no k transpose). Softmax stats in f32; normalization deferred
# to the small (heads, tq, Dh) context tensor.
# ----------------------------------------------------------------------------

def _attn_block_kernel(q_ref, k_ref, v_ref, x_ref, wo_ref, bo_ref, g_ref, b_ref,
                       o_ref, *, eps):
    q = q_ref[...]                         # (H, tq, Dh) bf16 (1/sqrt(Dh) pre-folded)
    k = k_ref[...]                         # (H, S,  Dh) bf16
    v = v_ref[...]                         # (H, S,  Dh) bf16

    # scores: contract last dims directly -> MXU, no XLU transpose of k
    s = jnp.einsum("hqd,hkd->hqk", q, k, preferred_element_type=jnp.float32)
    m = jnp.max(s, axis=-1, keepdims=True)               # stable softmax, f32 stats
    p = jnp.exp(s - m)
    l = jnp.sum(p, axis=-1, keepdims=True)               # (H, tq, 1)

    # unnormalized PV matmul; defer normalization to the small context tensor
    ctx = jnp.einsum("hqk,hkd->hqd", p.astype(v.dtype), v,
                     preferred_element_type=jnp.float32)
    ctx = ctx * (1.0 / l)                                 # exact, tiny divide count

    # output projection: one h-batched MXU contraction + leading-dim reduce
    # (replaces the per-head Python accumulation loop)
    proj = jnp.einsum("hqd,hdm->hqm", ctx.astype(wo_ref.dtype), wo_ref[...],
                      preferred_element_type=jnp.float32)   # (H, tq, D)
    out = jnp.sum(proj, axis=0) + bo_ref[...]               # (tq, D)

    # fused residual-add + LayerNorm epilogue (dropout == identity in eval)
    y = out + x_ref[...].astype(jnp.float32)
    mean = jnp.mean(y, axis=-1, keepdims=True)
    var = jnp.mean((y - mean) ** 2, axis=-1, keepdims=True)
    o_ref[...] = ((y - mean) * jax.lax.rsqrt(var + eps) * g_ref[...]
                  + b_ref[...]).astype(o_ref.dtype)


def attention_block(q3, k3, v3, x2d, wo_h, bo, g1, be1, *, eps=1e-5):
    n_head, Dh, D = wo_h.shape
    BH, S, _ = q3.shape
    B = BH // n_head
    M = x2d.shape[0]                       # B * S
    tq = _row_tile(S, cap=256)
    nq = S // tq
    kernel = functools.partial(_attn_block_kernel, eps=eps)
    return pl.pallas_call(
        kernel,
        out_shape=jax.ShapeDtypeStruct((M, D), jnp.bfloat16),
        grid=(B, nq),
        in_specs=[
            pl.BlockSpec((n_head, tq, Dh), lambda b, qi: (b, qi, 0)),
            pl.BlockSpec((n_head, S, Dh), lambda b, qi: (b, 0, 0)),
            pl.BlockSpec((n_head, S, Dh), lambda b, qi: (b, 0, 0)),
            pl.BlockSpec((tq, D), lambda b, qi: (b * nq + qi, 0)),
            pl.BlockSpec((n_head, Dh, D), lambda b, qi: (0, 0, 0)),
            pl.BlockSpec((1, D), lambda b, qi: (0, 0)),
            pl.BlockSpec((1, D), lambda b, qi: (0, 0)),
            pl.BlockSpec((1, D), lambda b, qi: (0, 0)),
        ],
        out_specs=pl.BlockSpec((tq, D), lambda b, qi: (b * nq + qi, 0)),
        compiler_params=_cparams(("parallel", "parallel")),
    )(q3, k3, v3, x2d, wo_h, bo, g1, be1)


# ----------------------------------------------------------------------------
# Kernel 3: FFN (linear-relu-linear) + residual + LayerNorm.
# M-tiled ("parallel") x H-tiled ("arbitrary") with an f32 VMEM accumulator.
# ----------------------------------------------------------------------------

def _ffn_block_kernel(x_ref, w1_ref, b1_ref, w2_ref, b2_ref, g_ref, b_ref,
                      o_ref, acc_ref, *, eps):
    kh = pl.program_id(1)

    @pl.when(kh == 0)
    def _():
        acc_ref[...] = jnp.zeros_like(acc_ref)

    x = x_ref[...]                                        # (tm, D) bf16
    h = jnp.dot(x, w1_ref[...], preferred_element_type=jnp.float32) + b1_ref[...]
    h = jnp.maximum(h, 0.0)                               # ReLU (dropout = identity)
    acc_ref[...] += jnp.dot(h.astype(w2_ref.dtype), w2_ref[...],
                            preferred_element_type=jnp.float32)

    @pl.when(kh == pl.num_programs(1) - 1)
    def _():
        r = acc_ref[...] + b2_ref[...] + x.astype(jnp.float32)   # residual
        mean = jnp.mean(r, axis=-1, keepdims=True)
        var = jnp.mean((r - mean) ** 2, axis=-1, keepdims=True)
        o_ref[...] = ((r - mean) * jax.lax.rsqrt(var + eps) * g_ref[...]
                      + b_ref[...]).astype(o_ref.dtype)


def ffn_block(y2d, w1, b1, w2, b2, g2, be2, *, eps=1e-5):
    M, D = y2d.shape
    H = w1.shape[1]
    tm = _row_tile(M)
    th = _col_tile(H)
    kernel = functools.partial(_ffn_block_kernel, eps=eps)
    return pl.pallas_call(
        kernel,
        out_shape=jax.ShapeDtypeStruct((M, D), jnp.bfloat16),
        grid=(M // tm, H // th),
        in_specs=[
            pl.BlockSpec((tm, D), lambda i, k: (i, 0)),
            pl.BlockSpec((D, th), lambda i, k: (0, k)),
            pl.BlockSpec((1, th), lambda i, k: (0, k)),
            pl.BlockSpec((th, D), lambda i, k: (k, 0)),
            pl.BlockSpec((1, D), lambda i, k: (0, 0)),
            pl.BlockSpec((1, D), lambda i, k: (0, 0)),
            pl.BlockSpec((1, D), lambda i, k: (0, 0)),
        ],
        out_specs=pl.BlockSpec((tm, D), lambda i, k: (i, 0)),
        scratch_shapes=[pltpu.VMEM((tm, D), jnp.float32)],
        compiler_params=_cparams(("parallel", "arbitrary")),
    )(y2d, w1, b1, w2, b2, g2, be2)


# ----------------------------------------------------------------------------
# One-time parameter preparation (hoisted out of the jitted forward):
# fused QKV weight/bias (with 1/sqrt(head_dim) folded into Wq/bq), per-head Wo,
# bf16 weight casts, (1, D) bias/LN reshapes.
# ----------------------------------------------------------------------------

def prepare_layer_params(p, n_head):
    D = p["wq"].shape[0]
    head_dim = D                          # the PyTorch module sets head_dim = model_dim
    P = n_head * head_dim
    scale = 1.0 / math.sqrt(head_dim)
    wqkv = jnp.concatenate([p["wq"] * scale, p["wk"], p["wv"]], axis=1)
    bqkv = jnp.concatenate([p["bq"] * scale, p["bk"], p["bv"]]).reshape(1, 3 * P)
    return {
        "wqkv": wqkv.astype(jnp.bfloat16),
        "bqkv": bqkv.astype(jnp.float32),
        "wo_h": p["wo"].reshape(n_head, head_dim, D).astype(jnp.bfloat16),
        "bo": p["bo"].reshape(1, D).astype(jnp.float32),
        "g1": p["g1"].reshape(1, D).astype(jnp.float32),
        "be1": p["be1"].reshape(1, D).astype(jnp.float32),
        "w1": p["w1"].astype(jnp.bfloat16),
        "b1": p["b1"].reshape(1, -1).astype(jnp.float32),
        "w2": p["w2"].astype(jnp.bfloat16),
        "b2": p["b2"].reshape(1, D).astype(jnp.float32),
        "g2": p["g2"].reshape(1, D).astype(jnp.float32),
        "be2": p["be2"].reshape(1, D).astype(jnp.float32),
    }


# ----------------------------------------------------------------------------
# Encoder (glue: reshapes / slices only; compute lives in the kernels)
# ----------------------------------------------------------------------------

def encoder_layer(x2d, p, *, B, S):
    n_head, Dh, D = p["wo_h"].shape
    P = n_head * Dh

    # --- multi-head attention block -----------------------------------------
    qkv = qkv_projection(x2d, p["wqkv"], p["bqkv"])               # (B*S, 3P) bf16

    # The module's idiosyncratic head view (.view(B, n_head, -1, head_dim) with
    # head_dim == model_dim) is a plain row-major reshape of the contiguous
    # projection output; done here in the wrapper.
    # TODO(synk): at production sizes (Dh % 128 == 0) this reshape can be fused
    #             into the kernels to avoid the extra HBM copies; at Dh=32 the
    #             in-kernel relayout is not reliably supported, so keep it here.
    q3 = qkv[:, 0 * P:1 * P].reshape(B * n_head, S, Dh)
    k3 = qkv[:, 1 * P:2 * P].reshape(B * n_head, S, Dh)
    v3 = qkv[:, 2 * P:3 * P].reshape(B * n_head, S, Dh)

    # norm1(attention(x) + x), fused in kernel 2 (dropout1 = identity)
    y2d = attention_block(q3, k3, v3, x2d, p["wo_h"], p["bo"], p["g1"], p["be1"])

    # --- feed-forward block: norm2(ffn(y) + y), fused in kernel 3 ------------
    z2d = ffn_block(y2d, p["w1"], p["b1"], p["w2"], p["b2"], p["g2"], p["be2"])
    return z2d


@jax.jit
def encoder(x, prepared_params):
    B, S, D = x.shape
    x2d = x.reshape(B * S, D).astype(jnp.bfloat16)
    for p in prepared_params:
        x2d = encoder_layer(x2d, p, B=B, S=S)
    return x2d.reshape(B, S, D).astype(jnp.float32)


# ----------------------------------------------------------------------------
# Deterministic parameter init + pure-JAX f32 reference for validation
# ----------------------------------------------------------------------------

def init_layer_params(key, model_dim, ffn_hidden, n_head):
    head_dim = model_dim
    proj = n_head * head_dim
    keys = jax.random.split(key, 10)

    def w(k, shape):
        return jax.random.normal(k, shape, dtype=jnp.float32) * 0.05

    return {
        "wq": w(keys[0], (model_dim, proj)), "bq": w(keys[1], (proj,)),
        "wk": w(keys[2], (model_dim, proj)), "bk": w(keys[3], (proj,)),
        "wv": w(keys[4], (model_dim, proj)), "bv": w(keys[5], (proj,)),
        "wo": w(keys[6], (proj, model_dim)), "bo": w(keys[7], (model_dim,)),
        "g1": jnp.ones((model_dim,), jnp.float32),
        "be1": jnp.zeros((model_dim,), jnp.float32),
        "w1": w(keys[8], (model_dim, ffn_hidden)),
        "b1": jnp.zeros((ffn_hidden,), jnp.float32),
        "w2": w(keys[9], (ffn_hidden, model_dim)),
        "b2": jnp.zeros((model_dim,), jnp.float32),
        "g2": jnp.ones((model_dim,), jnp.float32),
        "be2": jnp.zeros((model_dim,), jnp.float32),
    }


def _ref_layer(x, p, n_head):
    B, S, D = x.shape
    head_dim = D
    ln = lambda y, g, b: (y - y.mean(-1, keepdims=True)) / jnp.sqrt(
        y.var(-1, keepdims=True) + 1e-5) * g + b
    q = x @ p["wq"] + p["bq"]
    k = x @ p["wk"] + p["bk"]
    v = x @ p["wv"] + p["bv"]
    q_ = q.reshape(B, n_head, S, head_dim)
    k_ = k.reshape(B, n_head, S, head_dim)
    v_ = v.reshape(B, n_head, S, head_dim)
    s = jnp.einsum("bhqd,bhkd->bhqk", q_, k_) / math.sqrt(head_dim)
    s = jax.nn.softmax(s, axis=-1)
    ctx = jnp.einsum("bhqk,bhkd->bhqd", s, v_)
    ctx = jnp.transpose(ctx, (0, 2, 1, 3)).reshape(B, S, n_head * head_dim)
    a = ctx @ p["wo"] + p["bo"]
    y = ln(a + x, p["g1"], p["be1"])
    f = jnp.maximum(y @ p["w1"] + p["b1"], 0.0) @ p["w2"] + p["b2"]
    return ln(f + y, p["g2"], p["be2"])


def _ref_encoder(x, layer_params, n_head):
    for p in layer_params:
        x = _ref_layer(x, p, n_head)
    return x


# ----------------------------------------------------------------------------

if __name__ == "__main__":
    # Encoder(input_dim=32, ffn_hidden=64, n_head=2, n_layers=2, drop_prob=0.1)
    B, S, D = 2, 8, 32
    n_head, ffn_hidden, n_layers = 2, 64, 2

    root = jax.random.PRNGKey(0)
    x_key, *layer_keys = jax.random.split(root, n_layers + 1)
    x = jax.random.normal(x_key, (B, S, D), dtype=jnp.float32)
    raw_params = [init_layer_params(k, D, ffn_hidden, n_head) for k in layer_keys]

    # one-time parameter preparation (outside the jitted forward)
    params = [prepare_layer_params(p, n_head) for p in raw_params]

    out = encoder(x, params)
    out = jax.block_until_ready(out)

    ref = _ref_encoder(x, raw_params, n_head)
    # tolerance admits bf16 matmul-operand rounding (f32 accumulation, f32
    # softmax / LayerNorm stats); any structural error would be orders of
    # magnitude larger.
    np.testing.assert_allclose(np.asarray(out), np.asarray(ref),
                               rtol=3e-2, atol=3e-2)

    print("KERNEL_OK")
</pallas_src>

<mosaic_0001>
module attributes {stable_mosaic.version = 11 : i64} {
  func.func @_qkv_proj_kernel(%arg0: i32, %arg1: i32, %arg2: memref<16x32xbf16, #tpu.memory_space<vmem>>, %arg3: memref<32x192xbf16, #tpu.memory_space<vmem>>, %arg4: memref<1x192xf32, #tpu.memory_space<vmem>>, %arg5: memref<16x192xbf16, #tpu.memory_space<vmem>>) attributes {dimension_semantics = [#tpu.dimension_semantics<parallel>, #tpu.dimension_semantics<parallel>], iteration_bounds = array<i64: 1, 1>, scalar_prefetch = 0 : i64, scratch_operands = 0 : i64, tpu.core_type = #tpu.core_type<tc>, window_params = [{transform_indices = @transform_0, window_bounds = array<i64: 16, 32>}, {transform_indices = @transform_1, window_bounds = array<i64: 32, 192>}, {transform_indices = @transform_2, window_bounds = array<i64: 1, 192>}, {transform_indices = @transform_3, window_bounds = array<i64: 16, 192>}]} {
    %c0 = arith.constant 0 : index
    %c0_0 = arith.constant 0 : index
    %0 = vector.load %arg2[%c0, %c0_0] : memref<16x32xbf16, #tpu.memory_space<vmem>>, vector<16x32xbf16>
    %c0_1 = arith.constant 0 : index
    %c0_2 = arith.constant 0 : index
    %1 = vector.load %arg3[%c0_1, %c0_2] : memref<32x192xbf16, #tpu.memory_space<vmem>>, vector<32x192xbf16>
    %cst = arith.constant dense<0.000000e+00> : vector<16x192xf32>
    %2 = tpu.matmul %0, %1, %cst {dimension_numbers = #tpu.dot_dimension_numbers<[1], [0], [0], [1], [0, 0, 1, 1], [], []>} : vector<16x32xbf16>, vector<32x192xbf16>, vector<16x192xf32> -> vector<16x192xf32>
    %c0_3 = arith.constant 0 : index
    %c0_4 = arith.constant 0 : index
    %3 = vector.load %arg4[%c0_3, %c0_4] : memref<1x192xf32, #tpu.memory_space<vmem>>, vector<1x192xf32>
    %4 = vector.broadcast %3 : vector<1x192xf32> to vector<16x192xf32>
    %5 = arith.addf %2, %4 : vector<16x192xf32>
    %6 = arith.truncf %5 : vector<16x192xf32> to vector<16x192xbf16>
    %c0_5 = arith.constant 0 : index
    %c0_6 = arith.constant 0 : index
    %7 = vector.load %arg5[%c0_5, %c0_6] : memref<16x192xbf16, #tpu.memory_space<vmem>>, vector<16x192xbf16>
    tpu.vector_store %arg5[%c0_5, %c0_6], %6 {strides = array<i32>} : memref<16x192xbf16, #tpu.memory_space<vmem>>, vector<16x192xbf16>,
    return
  }
  func.func @transform_0(%arg0: i32, %arg1: i32) -> (i32, i32) {
    %c0_i32 = arith.constant 0 : i32
    %c0_i32_0 = arith.constant 0 : i32
    return %arg0, %c0_i32 : i32, i32
  }
  func.func @transform_1(%arg0: i32, %arg1: i32) -> (i32, i32) {
    %c0_i32 = arith.constant 0 : i32
    %c0_i32_0 = arith.constant 0 : i32
    return %c0_i32, %arg1 : i32, i32
  }
  func.func @transform_2(%arg0: i32, %arg1: i32) -> (i32, i32) {
    %c0_i32 = arith.constant 0 : i32
    %c0_i32_0 = arith.constant 0 : i32
    return %c0_i32, %arg1 : i32, i32
  }
  func.func @transform_3(%arg0: i32, %arg1: i32) -> (i32, i32) {
    %c0_i32 = arith.constant 0 : i32
    return %arg0, %arg1 : i32, i32
  }
}

module attributes {stable_mosaic.version = 11 : i64} {
  func.func @_ffn_block_kernel(%arg0: i32, %arg1: i32, %arg2: memref<16x32xbf16, #tpu.memory_space<vmem>>, %arg3: memref<32x64xbf16, #tpu.memory_space<vmem>>, %arg4: memref<1x64xf32, #tpu.memory_space<vmem>>, %arg5: memref<64x32xbf16, #tpu.memory_space<vmem>>, %arg6: memref<1x32xf32, #tpu.memory_space<vmem>>, %arg7: memref<1x32xf32, #tpu.memory_space<vmem>>, %arg8: memref<1x32xf32, #tpu.memory_space<vmem>>, %arg9: memref<16x32xbf16, #tpu.memory_space<vmem>>, %arg10: memref<16x32xf32, #tpu.memory_space<vmem>>) attributes {dimension_semantics = [#tpu.dimension_semantics<parallel>, #tpu.dimension_semantics<arbitrary>], iteration_bounds = array<i64: 1, 1>, scalar_prefetch = 0 : i64, scratch_operands = 1 : i64, tpu.core_type = #tpu.core_type<tc>, window_params = [{transform_indices = @transform_0, window_bounds = array<i64: 16, 32>}, {transform_indices = @transform_1, window_bounds = array<i64: 32, 64>}, {transform_indices = @transform_2, window_bounds = array<i64: 1, 64>}, {transform_indices = @transform_3, window_bounds = array<i64: 64, 32>}, {pipeline_mode = #tpu.pipeline_mode<synchronous>, transform_indices = @transform_4, window_bounds = array<i64: 1, 32>}, {pipeline_mode = #tpu.pipeline_mode<synchronous>, transform_indices = @transform_5, window_bounds = array<i64: 1, 32>}, {pipeline_mode = #tpu.pipeline_mode<synchronous>, transform_indices = @transform_6, window_bounds = array<i64: 1, 32>}, {transform_indices = @transform_7, window_bounds = array<i64: 16, 32>}]} {
    %c0_i32 = arith.constant 0 : i32
    %0 = arith.cmpi eq, %arg1, %c0_i32 : i32
    %1 = arith.extui %0 : i1 to i32
    %c0_i32_0 = arith.constant 0 : i32
    %2 = arith.cmpi ne, %1, %c0_i32_0 : i32
    scf.if %2 {
      %cst_16 = arith.constant 0.000000e+00 : f32
      %20 = vector.broadcast %cst_16 : f32 to vector<16x32xf32>
      %c0_17 = arith.constant 0 : index
      %c0_18 = arith.constant 0 : index
      %21 = vector.load %arg10[%c0_17, %c0_18] : memref<16x32xf32, #tpu.memory_space<vmem>>, vector<16x32xf32>
      tpu.vector_store %arg10[%c0_17, %c0_18], %20 {strides = array<i32>} : memref<16x32xf32, #tpu.memory_space<vmem>>, vector<16x32xf32>,
    } else {
    }
    %c0 = arith.constant 0 : index
    %c0_1 = arith.constant 0 : index
    %3 = vector.load %arg2[%c0, %c0_1] : memref<16x32xbf16, #tpu.memory_space<vmem>>, vector<16x32xbf16>
    %c0_2 = arith.constant 0 : index
    %c0_3 = arith.constant 0 : index
    %4 = vector.load %arg3[%c0_2, %c0_3] : memref<32x64xbf16, #tpu.memory_space<vmem>>, vector<32x64xbf16>
    %cst = arith.constant dense<0.000000e+00> : vector<16x64xf32>
    %5 = tpu.matmul %3, %4, %cst {dimension_numbers = #tpu.dot_dimension_numbers<[1], [0], [0], [1], [0, 0, 1, 1], [], []>} : vector<16x32xbf16>, vector<32x64xbf16>, vector<16x64xf32> -> vector<16x64xf32>
    %c0_4 = arith.constant 0 : index
    %c0_5 = arith.constant 0 : index
    %6 = vector.load %arg4[%c0_4, %c0_5] : memref<1x64xf32, #tpu.memory_space<vmem>>, vector<1x64xf32>
    %7 = vector.broadcast %6 : vector<1x64xf32> to vector<16x64xf32>
    %8 = arith.addf %5, %7 : vector<16x64xf32>
    %cst_6 = arith.constant 0.000000e+00 : f32
    %9 = vector.broadcast %cst_6 : f32 to vector<16x64xf32>
    %10 = arith.maximumf %8, %9 : vector<16x64xf32>
    %c0_7 = arith.constant 0 : index
    %c0_8 = arith.constant 0 : index
    %11 = vector.load %arg10[%c0_7, %c0_8] : memref<16x32xf32, #tpu.memory_space<vmem>>, vector<16x32xf32>
    %12 = arith.truncf %10 : vector<16x64xf32> to vector<16x64xbf16>
    %c0_9 = arith.constant 0 : index
    %c0_10 = arith.constant 0 : index
    %13 = vector.load %arg5[%c0_9, %c0_10] : memref<64x32xbf16, #tpu.memory_space<vmem>>, vector<64x32xbf16>
    %cst_11 = arith.constant dense<0.000000e+00> : vector<16x32xf32>
    %14 = tpu.matmul %12, %13, %cst_11 {dimension_numbers = #tpu.dot_dimension_numbers<[1], [0], [0], [1], [0, 0, 1, 1], [], []>} : vector<16x64xbf16>, vector<64x32xbf16>, vector<16x32xf32> -> vector<16x32xf32>
    %15 = arith.addf %11, %14 : vector<16x32xf32>
    %c0_12 = arith.constant 0 : index
    %c0_13 = arith.constant 0 : index
    %16 = vector.load %arg10[%c0_12, %c0_13] : memref<16x32xf32, #tpu.memory_space<vmem>>, vector<16x32xf32>
    tpu.vector_store %arg10[%c0_12, %c0_13], %15 {strides = array<i32>} : memref<16x32xf32, #tpu.memory_space<vmem>>, vector<16x32xf32>,
    %c0_i32_14 = arith.constant 0 : i32
    %17 = arith.cmpi eq, %arg1, %c0_i32_14 : i32
    %18 = arith.extui %17 : i1 to i32
    %c0_i32_15 = arith.constant 0 : i32
    %19 = arith.cmpi ne, %18, %c0_i32_15 : i32
    scf.if %19 {
      %c0_16 = arith.constant 0 : index
      %c0_17 = arith.constant 0 : index
      %20 = vector.load %arg10[%c0_16, %c0_17] : memref<16x32xf32, #tpu.memory_space<vmem>>, vector<16x32xf32>
      %c0_18 = arith.constant 0 : index
      %c0_19 = arith.constant 0 : index
      %21 = vector.load %arg6[%c0_18, %c0_19] : memref<1x32xf32, #tpu.memory_space<vmem>>, vector<1x32xf32>
      %22 = vector.broadcast %21 : vector<1x32xf32> to vector<16x32xf32>
      %23 = arith.addf %20, %22 : vector<16x32xf32>
      %24 = arith.extf %3 : vector<16x32xbf16> to vector<16x32xf32>
      %25 = arith.addf %23, %24 : vector<16x32xf32>
      %cst_20 = arith.constant dense<0.000000e+00> : vector<16xf32>
      %26 = vector.multi_reduction <add>, %25, %cst_20 [1] : vector<16x32xf32> to vector<16xf32>
      %27 = vector.shape_cast %26 : vector<16xf32> to vector<16x1xf32>
      %cst_21 = arith.constant 3.200000e+01 : f32
      %28 = vector.broadcast %cst_21 : f32 to vector<16x1xf32>
      %29 = arith.divf %27, %28 : vector<16x1xf32>
      %30 = vector.broadcast %29 : vector<16x1xf32> to vector<16x32xf32>
      %31 = arith.subf %25, %30 : vector<16x32xf32>
      %32 = arith.mulf %31, %31 : vector<16x32xf32>
      %cst_22 = arith.constant dense<0.000000e+00> : vector<16xf32>
      %33 = vector.multi_reduction <add>, %32, %cst_22 [1] : vector<16x32xf32> to vector<16xf32>
      %34 = vector.shape_cast %33 : vector<16xf32> to vector<16x1xf32>
      %cst_23 = arith.constant 3.200000e+01 : f32
      %35 = vector.broadcast %cst_23 : f32 to vector<16x1xf32>
      %36 = arith.divf %34, %35 : vector<16x1xf32>
      %37 = vector.broadcast %29 : vector<16x1xf32> to vector<16x32xf32>
      %38 = arith.subf %25, %37 : vector<16x32xf32>
      %cst_24 = arith.constant 9.99999974E-6 : f32
      %39 = vector.broadcast %cst_24 : f32 to vector<16x1xf32>
      %40 = arith.addf %36, %39 : vector<16x1xf32>
      %41 = math.rsqrt %40 : vector<16x1xf32>
      %42 = vector.broadcast %41 : vector<16x1xf32> to vector<16x32xf32>
      %43 = arith.mulf %38, %42 : vector<16x32xf32>
      %c0_25 = arith.constant 0 : index
      %c0_26 = arith.constant 0 : index
      %44 = vector.load %arg7[%c0_25, %c0_26] : memref<1x32xf32, #tpu.memory_space<vmem>>, vector<1x32xf32>
      %45 = vector.broadcast %44 : vector<1x32xf32> to vector<16x32xf32>
      %46 = arith.mulf %43, %45 : vector<16x32xf32>
      %c0_27 = arith.constant 0 : index
      %c0_28 = arith.constant 0 : index
      %47 = vector.load %arg8[%c0_27, %c0_28] : memref<1x32xf32, #tpu.memory_space<vmem>>, vector<1x32xf32>
      %48 = vector.broadcast %47 : vector<1x32xf32> to vector<16x32xf32>
      %49 = arith.addf %46, %48 : vector<16x32xf32>
      %50 = arith.truncf %49 : vector<16x32xf32> to vector<16x32xbf16>
      %c0_29 = arith.constant 0 : index
      %c0_30 = arith.constant 0 : index
      %51 = vector.load %arg9[%c0_29, %c0_30] : memref<16x32xbf16, #tpu.memory_space<vmem>>, vector<16x32xbf16>
      tpu.vector_store %arg9[%c0_29, %c0_30], %50 {strides = array<i32>} : memref<16x32xbf16, #tpu.memory_space<vmem>>, vector<16x32xbf16>,
    } else {
    }
    return
  }
  func.func @transform_0(%arg0: i32, %arg1: i32) -> (i32, i32) {
    %c0_i32 = arith.constant 0 : i32
    %c0_i32_0 = arith.constant 0 : i32
    return %arg0, %c0_i32 : i32, i32
  }
  func.func @transform_1(%arg0: i32, %arg1: i32) -> (i32, i32) {
    %c0_i32 = arith.constant 0 : i32
    %c0_i32_0 = arith.constant 0 : i32
    return %c0_i32, %arg1 : i32, i32
  }
  func.func @transform_2(%arg0: i32, %arg1: i32) -> (i32, i32) {
    %c0_i32 = arith.constant 0 : i32
    %c0_i32_0 = arith.constant 0 : i32
    return %c0_i32, %arg1 : i32, i32
  }
  func.func @transform_3(%arg0: i32, %arg1: i32) -> (i32, i32) {
    %c0_i32 = arith.constant 0 : i32
    %c0_i32_0 = arith.constant 0 : i32
    return %arg1, %c0_i32 : i32, i32
  }
  func.func @transform_4(%arg0: i32, %arg1: i32) -> (i32, i32) {
    %c0_i32 = arith.constant 0 : i32
    %c0_i32_0 = arith.constant 0 : i32
    %c0_i32_1 = arith.constant 0 : i32
    return %c0_i32, %c0_i32_0 : i32, i32
  }
  func.func @transform_5(%arg0: i32, %arg1: i32) -> (i32, i32) {
    %c0_i32 = arith.constant 0 : i32
    %c0_i32_0 = arith.constant 0 : i32
    %c0_i32_1 = arith.constant 0 : i32
    return %c0_i32, %c0_i32_0 : i32, i32
  }
  func.func @transform_6(%arg0: i32, %arg1: i32) -> (i32, i32) {
    %c0_i32 = arith.constant 0 : i32
    %c0_i32_0 = arith.constant 0 : i32
    %c0_i32_1 = arith.constant 0 : i32
    return %c0_i32, %c0_i32_0 : i32, i32
  }
  func.func @transform_7(%arg0: i32, %arg1: i32) -> (i32, i32) {
    %c0_i32 = arith.constant 0 : i32
    %c0_i32_0 = arith.constant 0 : i32
    return %arg0, %c0_i32 : i32, i32
  }
}

module attributes {stable_mosaic.version = 11 : i64} {
  func.func @_attn_block_kernel(%arg0: i32, %arg1: i32, %arg2: memref<2x8x32xbf16, #tpu.memory_space<vmem>>, %arg3: memref<2x8x32xbf16, #tpu.memory_space<vmem>>, %arg4: memref<2x8x32xbf16, #tpu.memory_space<vmem>>, %arg5: memref<8x32xbf16, #tpu.memory_space<vmem>>, %arg6: memref<2x32x32xbf16, #tpu.memory_space<vmem>>, %arg7: memref<1x32xf32, #tpu.memory_space<vmem>>, %arg8: memref<1x32xf32, #tpu.memory_space<vmem>>, %arg9: memref<1x32xf32, #tpu.memory_space<vmem>>, %arg10: memref<8x32xbf16, #tpu.memory_space<vmem>>) attributes {dimension_semantics = [#tpu.dimension_semantics<parallel>, #tpu.dimension_semantics<parallel>], iteration_bounds = array<i64: 2, 1>, scalar_prefetch = 0 : i64, scratch_operands = 0 : i64, tpu.core_type = #tpu.core_type<tc>, window_params = [{transform_indices = @transform_0, window_bounds = array<i64: 2, 8, 32>}, {transform_indices = @transform_1, window_bounds = array<i64: 2, 8, 32>}, {transform_indices = @transform_2, window_bounds = array<i64: 2, 8, 32>}, {transform_indices = @transform_3, window_bounds = array<i64: 8, 32>}, {pipeline_mode = #tpu.pipeline_mode<synchronous>, transform_indices = @transform_4, window_bounds = array<i64: 2, 32, 32>}, {pipeline_mode = #tpu.pipeline_mode<synchronous>, transform_indices = @transform_5, window_bounds = array<i64: 1, 32>}, {pipeline_mode = #tpu.pipeline_mode<synchronous>, transform_indices = @transform_6, window_bounds = array<i64: 1, 32>}, {pipeline_mode = #tpu.pipeline_mode<synchronous>, transform_indices = @transform_7, window_bounds = array<i64: 1, 32>}, {transform_indices = @transform_8, window_bounds = array<i64: 8, 32>}]} {
    %c0 = arith.constant 0 : index
    %c0_0 = arith.constant 0 : index
    %c0_1 = arith.constant 0 : index
    %0 = vector.load %arg2[%c0, %c0_0, %c0_1] : memref<2x8x32xbf16, #tpu.memory_space<vmem>>, vector<2x8x32xbf16>
    %c0_2 = arith.constant 0 : index
    %c0_3 = arith.constant 0 : index
    %c0_4 = arith.constant 0 : index
    %1 = vector.load %arg3[%c0_2, %c0_3, %c0_4] : memref<2x8x32xbf16, #tpu.memory_space<vmem>>, vector<2x8x32xbf16>
    %c0_5 = arith.constant 0 : index
    %c0_6 = arith.constant 0 : index
    %c0_7 = arith.constant 0 : index
    %2 = vector.load %arg4[%c0_5, %c0_6, %c0_7] : memref<2x8x32xbf16, #tpu.memory_space<vmem>>, vector<2x8x32xbf16>
    "tpu.trace_start"() <{level = 10 : i32, message = "hqd,hkd->hqk"}> : () -> ()
    %cst = arith.constant dense<0.000000e+00> : vector<2x8x8xf32>
    %3 = tpu.matmul %0, %1, %cst {dimension_numbers = #tpu.dot_dimension_numbers<[2], [2], [1], [1], [0, 0, 0, 1, 1, 1], [0], [0]>} : vector<2x8x32xbf16>, vector<2x8x32xbf16>, vector<2x8x8xf32> -> vector<2x8x8xf32>
    "tpu.trace_stop"() : () -> ()
    %cst_8 = arith.constant dense<0xFF800000> : vector<2x8xf32>
    %4 = vector.multi_reduction <maximumf>, %3, %cst_8 [2] : vector<2x8x8xf32> to vector<2x8xf32>
    %5 = vector.shape_cast %4 : vector<2x8xf32> to vector<2x8x1xf32>
    %6 = vector.broadcast %5 : vector<2x8x1xf32> to vector<2x8x8xf32>
    %7 = arith.subf %3, %6 : vector<2x8x8xf32>
    %8 = math.exp %7 : vector<2x8x8xf32>
    %cst_9 = arith.constant dense<0.000000e+00> : vector<2x8xf32>
    %9 = vector.multi_reduction <add>, %8, %cst_9 [2] : vector<2x8x8xf32> to vector<2x8xf32>
    %10 = vector.shape_cast %9 : vector<2x8xf32> to vector<2x8x1xf32>
    %11 = arith.truncf %8 : vector<2x8x8xf32> to vector<2x8x8xbf16>
    "tpu.trace_start"() <{level = 10 : i32, message = "hqk,hkd->hqd"}> : () -> ()
    %cst_10 = arith.constant dense<0.000000e+00> : vector<2x8x32xf32>
    %12 = tpu.matmul %11, %2, %cst_10 {dimension_numbers = #tpu.dot_dimension_numbers<[2], [1], [1], [2], [0, 0, 0, 1, 1, 2], [0], [0]>} : vector<2x8x8xbf16>, vector<2x8x32xbf16>, vector<2x8x32xf32> -> vector<2x8x32xf32>
    "tpu.trace_stop"() : () -> ()
    %cst_11 = arith.constant 1.000000e+00 : f32
    %13 = vector.broadcast %cst_11 : f32 to vector<2x8x1xf32>
    %14 = arith.divf %13, %10 : vector<2x8x1xf32>
    %15 = vector.broadcast %14 : vector<2x8x1xf32> to vector<2x8x32xf32>
    %16 = arith.mulf %12, %15 : vector<2x8x32xf32>
    %17 = arith.truncf %16 : vector<2x8x32xf32> to vector<2x8x32xbf16>
    %c0_12 = arith.constant 0 : index
    %c0_13 = arith.constant 0 : index
    %c0_14 = arith.constant 0 : index
    %18 = vector.load %arg6[%c0_12, %c0_13, %c0_14] : memref<2x32x32xbf16, #tpu.memory_space<vmem>>, vector<2x32x32xbf16>
    "tpu.trace_start"() <{level = 10 : i32, message = "hqd,hdm->hqm"}> : () -> ()
    %cst_15 = arith.constant dense<0.000000e+00> : vector<2x8x32xf32>
    %19 = tpu.matmul %17, %18, %cst_15 {dimension_numbers = #tpu.dot_dimension_numbers<[2], [1], [1], [2], [0, 0, 0, 1, 1, 2], [0], [0]>} : vector<2x8x32xbf16>, vector<2x32x32xbf16>, vector<2x8x32xf32> -> vector<2x8x32xf32>
    "tpu.trace_stop"() : () -> ()
    %cst_16 = arith.constant dense<0.000000e+00> : vector<8x32xf32>
    %20 = vector.multi_reduction <add>, %19, %cst_16 [0] : vector<2x8x32xf32> to vector<8x32xf32>
    %c0_17 = arith.constant 0 : index
    %c0_18 = arith.constant 0 : index
    %21 = vector.load %arg7[%c0_17, %c0_18] : memref<1x32xf32, #tpu.memory_space<vmem>>, vector<1x32xf32>
    %22 = vector.broadcast %21 : vector<1x32xf32> to vector<8x32xf32>
    %23 = arith.addf %20, %22 : vector<8x32xf32>
    %c0_19 = arith.constant 0 : index
    %c0_20 = arith.constant 0 : index
    %24 = vector.load %arg5[%c0_19, %c0_20] : memref<8x32xbf16, #tpu.memory_space<vmem>>, vector<8x32xbf16>
    %25 = arith.extf %24 : vector<8x32xbf16> to vector<8x32xf32>
    %26 = arith.addf %23, %25 : vector<8x32xf32>
    %cst_21 = arith.constant dense<0.000000e+00> : vector<8xf32>
    %27 = vector.multi_reduction <add>, %26, %cst_21 [1] : vector<8x32xf32> to vector<8xf32>
    %28 = vector.shape_cast %27 : vector<8xf32> to vector<8x1xf32>
    %cst_22 = arith.constant 3.200000e+01 : f32
    %29 = vector.broadcast %cst_22 : f32 to vector<8x1xf32>
    %30 = arith.divf %28, %29 : vector<8x1xf32>
    %31 = vector.broadcast %30 : vector<8x1xf32> to vector<8x32xf32>
    %32 = arith.subf %26, %31 : vector<8x32xf32>
    %33 = arith.mulf %32, %32 : vector<8x32xf32>
    %cst_23 = arith.constant dense<0.000000e+00> : vector<8xf32>
    %34 = vector.multi_reduction <add>, %33, %cst_23 [1] : vector<8x32xf32> to vector<8xf32>
    %35 = vector.shape_cast %34 : vector<8xf32> to vector<8x1xf32>
    %cst_24 = arith.constant 3.200000e+01 : f32
    %36 = vector.broadcast %cst_24 : f32 to vector<8x1xf32>
    %37 = arith.divf %35, %36 : vector<8x1xf32>
    %38 = vector.broadcast %30 : vector<8x1xf32> to vector<8x32xf32>
    %39 = arith.subf %26, %38 : vector<8x32xf32>
    %cst_25 = arith.constant 9.99999974E-6 : f32
    %40 = vector.broadcast %cst_25 : f32 to vector<8x1xf32>
    %41 = arith.addf %37, %40 : vector<8x1xf32>
    %42 = math.rsqrt %41 : vector<8x1xf32>
    %43 = vector.broadcast %42 : vector<8x1xf32> to vector<8x32xf32>
    %44 = arith.mulf %39, %43 : vector<8x32xf32>
    %c0_26 = arith.constant 0 : index
    %c0_27 = arith.constant 0 : index
    %45 = vector.load %arg8[%c0_26, %c0_27] : memref<1x32xf32, #tpu.memory_space<vmem>>, vector<1x32xf32>
    %46 = vector.broadcast %45 : vector<1x32xf32> to vector<8x32xf32>
    %47 = arith.mulf %44, %46 : vector<8x32xf32>
    %c0_28 = arith.constant 0 : index
    %c0_29 = arith.constant 0 : index
    %48 = vector.load %arg9[%c0_28, %c0_29] : memref<1x32xf32, #tpu.memory_space<vmem>>, vector<1x32xf32>
    %49 = vector.broadcast %48 : vector<1x32xf32> to vector<8x32xf32>
    %50 = arith.addf %47, %49 : vector<8x32xf32>
    %51 = arith.truncf %50 : vector<8x32xf32> to vector<8x32xbf16>
    %c0_30 = arith.constant 0 : index
    %c0_31 = arith.constant 0 : index
    %52 = vector.load %arg10[%c0_30, %c0_31] : memref<8x32xbf16, #tpu.memory_space<vmem>>, vector<8x32xbf16>
    tpu.vector_store %arg10[%c0_30, %c0_31], %51 {strides = array<i32>} : memref<8x32xbf16, #tpu.memory_space<vmem>>, vector<8x32xbf16>,
    return
  }
  func.func @transform_0(%arg0: i32, %arg1: i32) -> (i32, i32, i32) {
    %c0_i32 = arith.constant 0 : i32
    %c0_i32_0 = arith.constant 0 : i32
    return %arg0, %arg1, %c0_i32 : i32, i32, i32
  }
  func.func @transform_1(%arg0: i32, %arg1: i32) -> (i32, i32, i32) {
    %c0_i32 = arith.constant 0 : i32
    %c0_i32_0 = arith.constant 0 : i32
    %c0_i32_1 = arith.constant 0 : i32
    return %arg0, %c0_i32, %c0_i32_0 : i32, i32, i32
  }
  func.func @transform_2(%arg0: i32, %arg1: i32) -> (i32, i32, i32) {
    %c0_i32 = arith.constant 0 : i32
    %c0_i32_0 = arith.constant 0 : i32
    %c0_i32_1 = arith.constant 0 : i32
    return %arg0, %c0_i32, %c0_i32_0 : i32, i32, i32
  }
  func.func @transform_3(%arg0: i32, %arg1: i32) -> (i32, i32) {
    %c1_i32 = arith.constant 1 : i32
    %0 = arith.muli %arg0, %c1_i32 : i32
    %1 = arith.addi %0, %arg1 : i32
    %c0_i32 = arith.constant 0 : i32
    %c0_i32_0 = arith.constant 0 : i32
    return %1, %c0_i32 : i32, i32
  }
  func.func @transform_4(%arg0: i32, %arg1: i32) -> (i32, i32, i32) {
    %c0_i32 = arith.constant 0 : i32
    %c0_i32_0 = arith.constant 0 : i32
    %c0_i32_1 = arith.constant 0 : i32
    %c0_i32_2 = arith.constant 0 : i32
    return %c0_i32, %c0_i32_0, %c0_i32_1 : i32, i32, i32
  }
  func.func @transform_5(%arg0: i32, %arg1: i32) -> (i32, i32) {
    %c0_i32 = arith.constant 0 : i32
    %c0_i32_0 = arith.constant 0 : i32
    %c0_i32_1 = arith.constant 0 : i32
    return %c0_i32, %c0_i32_0 : i32, i32
  }
  func.func @transform_6(%arg0: i32, %arg1: i32) -> (i32, i32) {
    %c0_i32 = arith.constant 0 : i32
    %c0_i32_0 = arith.constant 0 : i32
    %c0_i32_1 = arith.constant 0 : i32
    return %c0_i32, %c0_i32_0 : i32, i32
  }
  func.func @transform_7(%arg0: i32, %arg1: i32) -> (i32, i32) {
    %c0_i32 = arith.constant 0 : i32
    %c0_i32_0 = arith.constant 0 : i32
    %c0_i32_1 = arith.constant 0 : i32
    return %c0_i32, %c0_i32_0 : i32, i32
  }
  func.func @transform_8(%arg0: i32, %arg1: i32) -> (i32, i32) {
    %c1_i32 = arith.constant 1 : i32
    %0 = arith.muli %arg0, %c1_i32 : i32
    %1 = arith.addi %0, %arg1 : i32
    %c0_i32 = arith.constant 0 : i32
    %c0_i32_0 = arith.constant 0 : i32
    return %1, %c0_i32 : i32, i32
  }
}

</mosaic_0001>

<bundles_post_ra>
// kernel: encoder.6
= control target key start
LH: loop header
LB: loop body
LE: loop exit
PB: predicated region body
PF: predicated region fallthrough
CT: control target
= control target key end

     0   :  { %vm52_vm0 = vcmask 261120   ;;  %vm86_vm1 = vcmask 1043456   ;;  %vm87_vm2 = vcmask 523268   ;;  %s178_s1 = inlined_call_operand.vmem [shape: bf16[32,192], index: 1, kind: input, shape index: {}]   ;;  %s179_s0 = inlined_call_operand.vmem [shape: bf16[16,32], index: 0, kind: input, shape index: {}]   ;;  %s180_s2 = inlined_call_operand.vmem [shape: f32[1,192], index: 2, kind: input, shape index: {}]   ;;  %s181_s3 = inlined_call_operand.vmem [shape: bf16[16,192], index: 3, kind: output, shape index: {}]  }
   0x1   :  { %v109_v0 = vld [vmem:[%s178_s1 + $0x10] sm:$0xf]  ;;  %v121_v1 = vld [vmem:[%s178_s1 + $0x14] sm:$0xf0]  ;;  %v120_v2 = vld [vmem:[%s178_s1 + $0x14] sm:$0xf] }
   0x2   :  { %v110_v3 = vor.u32 %v121_v1, %v109_v0  ;;  %v111_v4 = vld [vmem:[%s178_s1 + $0x18] sm:$0xf0]  ;;  %v101_v5 = vld [vmem:[%s178_s1] sm:$0xf]  ;;  %v119_v6 = vld [vmem:[%s178_s1 + $0x4] sm:$0xf0] }
   0x3   :  { %v114_v7 = vor.u32 %v120_v2, %v111_v4  ;;  %v118_v8 = vld [vmem:[%s178_s1 + $0x4] sm:$0xf]  ;;  %v103_v9 = vld [vmem:[%s178_s1 + $0x8] sm:$0xf0]  ;;  %v102_v10 = vor.u32 %v119_v6, %v101_v5  ;;  %v21_v13 = vld [vmem:[%s180_s2] sm:$0x3] }
   0x4   :  { %62 = vmatpush.bf16.msra.mxu0 %v110_v3  ;;  %v106_v11 = vor.u32 %v118_v8, %v103_v9  ;;  %v117_v12 = vld [vmem:[%s179_s0] sm:$0xff]  ;;  %v23_v14 = vperm.slane %v21_v13, 0  ;;  %v24_v15 = vperm.slane %v21_v13, 1  ;;  %vm88_vm3 = vmor %vm87_vm2, %vm86_vm1 }
   0x5   :  { %76 = vmatpush.bf16.msra.mxu1 %v114_v7 }
   0x8   :  { %63 = vmatpush.bf16.msra.mxu0 %v102_v10 }
   0x9   :  { %77 = vmatpush.bf16.msra.mxu1 %v106_v11 }
   0xb   :  { %115 = vmatmul.msk.bf16.vlgmr.msra.gmra.mxu0 %vm52_vm0, %v117_v12 }
   0xc   :  { %116 = vmatmul.msk.bf16.vlgmr.msra.gmra.mxu1 %vm52_vm0, %v117_v12 }
  0x88   :  { %v65_v16 = vpop.f32.mrf.mxu0 }
  0x89   :  { %v66_v17 = vadd.f32 %v65_v16, %v23_v14  ;;  %v79_v18 = vpop.f32.mrf.mxu1 }
  0x8a   :  { %v80_v19 = vadd.f32 %v79_v18, %v24_v15 }
  0x8c   :  { %v84_v20 = vpack.c.bf16 %v80_v19, %v66_v17 }
  0x8e   :  { %89 = vst.msk [vmem:[%s181_s3] sm:$0xff] %vm88_vm3, %v84_v20 }
  0x90   :  { %v67_v21 = vpop.f32.mrf.mxu0 }
  0x91   :  { %v68_v22 = vadd.f32 %v67_v21, %v23_v14  ;;  %v81_v23 = vpop.f32.mrf.mxu1 }
  0x92   :  { %v82_v24 = vadd.f32 %v81_v23, %v24_v15 }
  0x94   :  { %v85_v25 = vpack.c.bf16 %v82_v24, %v68_v22 }
  0x96   :  { %90 = vst.msk [vmem:[%s181_s3 + $0x8] sm:$0xff] %vm88_vm3, %v85_v25 }

// kernel: encoder.8
= control target key start
LH: loop header
LB: loop body
LE: loop exit
PB: predicated region body
PF: predicated region fallthrough
CT: control target
= control target key end

     0   :  { %vm31_vm0 = vcmask 261120   ;;  %v274_v7 = vmov 0.0   ;;  %vm116_vm1 = vcmask 523264   ;;  %v275_v34 = vmov 32.0   ;;  %s367_s1 = inlined_call_operand.vmem [shape: bf16[32,64], index: 1, kind: input, shape index: {}]   ;;  %s368_s2 = inlined_call_operand.vmem [shape: f32[1,64], index: 2, kind: input, shape index: {}]   ;;  %s369_s0 = inlined_call_operand.vmem [shape: bf16[16,32], index: 0, kind: input, shape index: {}]   ;;  %s370_s3 = inlined_call_operand.vmem [shape: bf16[64,32], index: 3, kind: input, shape index: {}]   ;;  %s371_s4 = inlined_call_operand.vmem [shape: f32[1,32], index: 4, kind: input, shape index: {}]   ;;  %s372_s5 = inlined_call_operand.vmem [shape: f32[1,32], index: 5, kind: input, shape index: {}]   ;;  %s373_s6 = inlined_call_operand.vmem [shape: f32[1,32], index: 6, kind: input, shape index: {}]   ;;  %s374_s7 = inlined_call_operand.vmem [shape: bf16[16,32], index: 7, kind: output, shape index: {}]  }
   0x1   :  { %v257_v0 = vld [vmem:[%s367_s1 + $0x8] sm:$0xff]  ;;  %v256_v1 = vld [vmem:[%s367_s1] sm:$0xff]  ;;  %v261_v3 = vld [vmem:[%s370_s3 + $0x18] sm:$0xff]  ;;  %32 = vst.msk [vmem:[#allocation2] sm:$0xff] %vm31_vm0, %v274_v7  ;;  %268 = vrcp.f32 %v275_v34  ;;  %vm218_vm7 = vcmask 257024  }
   0x2   :  { %71 = vmatpush.bf16.msra.mxu0 %v257_v0  ;;  %v255_v2 = vld [vmem:[%s369_s0] sm:$0xff]  ;;  %124 = vmatpush.bf16.msra.mxu1 %v261_v3  ;;  %v260_v4 = vld [vmem:[%s370_s3 + $0x10] sm:$0xff]  ;;  %v259_v5 = vld [vmem:[%s370_s3 + $0x8] sm:$0xff]  ;;  %33 = vst.msk [vmem:[#allocation2 + $0x8] sm:$0xff] %vm31_vm0, %v274_v7 }
   0x3   :  { %v258_v6 = vld [vmem:[%s370_s3] sm:$0xff] }
   0x4   :  { %v264_v9 = vld [vmem:[%s368_s2] ss:$0 sm:$0xff] }
   0x5   :  { %v34_v20 = vld [vmem:[%s369_s0] sm:$0xff]  }
   0x6   :  { %72 = vmatpush.bf16.msra.mxu0 %v256_v1  ;;  %125 = vmatpush.bf16.msra.mxu1 %v260_v4  ;;  %v265_v21 = vld [vmem:[%s371_s4] ss:$0 sm:$0xff]  ;;  %v149_v24 = vunpack.c.l.bf16 %v34_v20  ;;  %v150_v29 = vunpack.c.h.bf16 %v34_v20 }
   0x7   :  { %v269_v35 = vpop.eup %268  ;;  %v266_v1 = vld [vmem:[%s372_s5] ss:$0 sm:$0xff] }
   0x8   :  { %v81_v16 = vld [vmem:[#allocation2] sm:$0xff]  ;;  %v160_v36 = vmul.f32 32.0, %v269_v35  ;;  %vm164_vm2 = vweird.f32 %v269_v35 }
   0x9   :  { %237 = vmatmul.msk.bf16.vlgmr.msra.gmra.mxu0 %vm31_vm0, %v255_v2  ;;  %v82_v19 = vld [vmem:[#allocation2 + $0x8] sm:$0xff]  ;;  %v267_v4 = vld [vmem:[%s373_s6] ss:$0 sm:$0xff] }
   0xa   :  { %126 = vmatpush.bf16.msra.mxu1 %v259_v5  ;;  %v161_v37 = vsub.f32 1.0, %v160_v36 }
   0xc   :  { %v162_v38 = vmul.f32 %v269_v35, %v161_v37 }
   0xe   :  { %127 = vmatpush.bf16.msra.mxu1 %v258_v6  ;;  %v163_v39 = vadd.f32 %v269_v35, %v162_v38 }
  0x10   :  { %v165_v40 = vsel %vm164_vm2, %v269_v35, %v163_v39 }
  0x86   :  { %v74_v8 = vpop.f32.mrf.mxu0 }
  0x87   :  { %v75_v10 = vadd.f32 %v264_v9, %v74_v8 }
  0x89   :  { %v79_v13 = vmax.f32 %v75_v10, 0.0 }
  0x8e   :  { %v76_v11 = vpop.f32.mrf.mxu0 }
  0x8f   :  { %v77_v12 = vadd.f32 %v264_v9, %v76_v11 }
  0x91   :  { %v80_v14 = vmax.f32 %v77_v12, 0.0 }
  0x93   :  { %v83_v15 = vpack.c.bf16 %v80_v14, %v79_v13 }
  0x95   :  { %254 = vmatmul.msk.bf16.vlgmr.msra.gmra.mxu1 %vm116_vm1, %v83_v15 }
 0x112   :  { %v129_v17 = vpop.f32.mrf.mxu1 }
 0x113   :  { %v134_v18 = vadd.f32 %v129_v17, %v81_v16 }
 0x115   :  { %136 = vst.msk [vmem:[#allocation2] sm:$0xff] %vm31_vm0, %v134_v18 }
 0x11a   :  { %v131_v22 = vpop.f32.mrf.mxu1 }
 0x11b   :  { %v135_v23 = vadd.f32 %v131_v22, %v82_v19 }
 0x11c   :  { %v141_v25 = vld [vmem:[#allocation2] sm:$0xff] }
 0x11d   :  { %137 = vst.msk [vmem:[#allocation2 + $0x8] sm:$0xff] %vm31_vm0, %v135_v23  ;;  %v147_v26 = vadd.f32 %v265_v21, %v141_v25 }
 0x11f   :  { %v151_v27 = vadd.f32 %v149_v24, %v147_v26 }
 0x121   :  { %v153_v28 = vsel %vm31_vm0, %v151_v27, 0.0 }
 0x122   :  { %154 = vadd.xlane.f32.xlu0 %v153_v28 }
 0x124   :  { %v142_v30 = vld [vmem:[#allocation2 + $0x8] sm:$0xff] }
 0x125   :  { %v148_v31 = vadd.f32 %v265_v21, %v142_v30 }
 0x127   :  { %v152_v32 = vadd.f32 %v150_v29, %v148_v31 }
 0x129   :  { %v156_v33 = vsel %vm31_vm0, %v152_v32, 0.0 }
 0x12a   :  { %157 = vadd.xlane.f32.xlu0 %v156_v33 }
 0x195   :  { %v155_v41 = vpop.xlane.xlu0 %154 }
 0x196   :  { %v166_v42 = vmul.f32 %v165_v40, %v155_v41 }
 0x198   :  { %v168_v43 = vsub.f32 %v151_v27, %v166_v42 }
 0x19a   :  { %v170_v44 = vmul.f32 %v168_v43, %v168_v43 }
 0x19c   :  { %v172_v45 = vsel %vm31_vm0, %v170_v44, 0.0 }
 0x19d   :  { %173 = vadd.xlane.f32.xlu1 %v172_v45  ;;  %v158_v46 = vpop.xlane.xlu0 %157 }
 0x19e   :  { %v167_v47 = vmul.f32 %v165_v40, %v158_v46 }
 0x1a0   :  { %v169_v48 = vsub.f32 %v152_v32, %v167_v47 }
 0x1a2   :  { %v171_v49 = vmul.f32 %v169_v48, %v169_v48 }
 0x1a4   :  { %v175_v50 = vsel %vm31_vm0, %v171_v49, 0.0 }
 0x1a5   :  { %176 = vadd.xlane.f32.xlu1 %v175_v50 }
 0x210   :  { %v174_v51 = vpop.xlane.xlu1 %173 }
 0x211   :  { %v178_v52 = vmul.f32 %v174_v51, %v165_v40 }
 0x213   :  { %v180_v53 = vadd.f32 1e-05, %v178_v52 }
 0x215   :  { %270 = vrsqrt.f32 %v180_v53  ;;  %vm188_vm4 = vweird.f32 %v180_v53 }
 0x218   :  { %v177_v54 = vpop.xlane.xlu1 %176 }
 0x219   :  { %v179_v55 = vmul.f32 %v177_v54, %v165_v40 }
 0x21b   :  { %v271_v56 = vpop.eup %270  ;;  %v181_v57 = vadd.f32 1e-05, %v179_v55 }
 0x21c   :  { %v183_v58 = vmul.f32 %v271_v56, %v180_v53  ;;  %vm189_vm3 = vweird.f32 %v271_v56 }
 0x21d   :  { %272 = vrsqrt.f32 %v181_v57  ;;  %vm190_vm5 = vmor %vm188_vm4, %vm189_vm3  ;;  %vm198_vm8 = vweird.f32 %v181_v57 }
 0x21e   :  { %v184_v59 = vmul.f32 %v271_v56, %v183_v58 }
 0x220   :  { %v185_v60 = vmul.f32 0.5, %v184_v59 }
 0x222   :  { %v186_v61 = vsub.f32 1.5, %v185_v60 }
 0x223   :  { %v273_v62 = vpop.eup %272 }
 0x224   :  { %v187_v63 = vmul.f32 %v271_v56, %v186_v61  ;;  %v193_v0 = vmul.f32 %v273_v62, %v181_v57  ;;  %vm199_vm6 = vweird.f32 %v273_v62 }
 0x225   :  { %vm200_vm9 = vmor %vm198_vm8, %vm199_vm6 }
 0x226   :  { %v191_v2 = vsel %vm190_vm5, %v271_v56, %v187_v63  ;;  %v194_v3 = vmul.f32 %v273_v62, %v193_v0 }
 0x227   :  { %v202_v5 = vmul.f32 %v191_v2, %v168_v43 }
 0x228   :  { %v195_v6 = vmul.f32 0.5, %v194_v3 }
 0x229   :  { %v208_v7 = vmul.f32 %v266_v1, %v202_v5 }
 0x22a   :  { %v196_v8 = vsub.f32 1.5, %v195_v6 }
 0x22b   :  { %v214_v9 = vadd.f32 %v267_v4, %v208_v7 }
 0x22c   :  { %v197_v10 = vmul.f32 %v273_v62, %v196_v8 }
 0x22d   :  { %v216_v11 = vpack.c.bf16 %v214_v9, %v214_v9 }
 0x22e   :  { %v201_v12 = vsel %vm200_vm9, %v273_v62, %v197_v10 }
 0x22f   :  { %219 = vst.msk [vmem:[%s374_s7] sm:$0xf] %vm218_vm7, %v216_v11  ;;  %v203_v13 = vmul.f32 %v201_v12, %v169_v48 }
 0x231   :  { %v209_v14 = vmul.f32 %v266_v1, %v203_v13 }
 0x233   :  { %v215_v15 = vadd.f32 %v267_v4, %v209_v14 }
 0x235   :  { %v217_v16 = vpack.c.bf16 %v215_v15, %v215_v15 }
 0x237   :  { %220 = vst.msk [vmem:[%s374_s7 + $0x4] sm:$0xf] %vm218_vm7, %v217_v16 }

// kernel: encoder.7
= control target key start
LH: loop header
LB: loop body
LE: loop exit
PB: predicated region body
PF: predicated region fallthrough
CT: control target
= control target key end

     0   :  { %s914_s27 = smov 0   ;;  %s916_s28 = smov 0   ;;  %s1005_s0 = inlined_call_operand.vmem [shape: bf16[4,8,32], index: 0, kind: input, shape index: {}]   ;;  %s1006_s1 = inlined_call_operand.vmem [shape: bf16[4,8,32], index: 1, kind: input, shape index: {}]   ;;  %s1007_s2 = inlined_call_operand.vmem [shape: bf16[4,8,32], index: 2, kind: input, shape index: {}]   ;;  %s1008_s3 = inlined_call_operand.vmem [shape: bf16[16,32], index: 3, kind: input, shape index: {}]   ;;  %s1009_s4 = inlined_call_operand.vmem [shape: bf16[2,32,32], index: 4, kind: input, shape index: {}]   ;;  %s1010_s5 = inlined_call_operand.vmem [shape: f32[1,32], index: 5, kind: input, shape index: {}]   ;;  %s1011_s6 = inlined_call_operand.vmem [shape: f32[1,32], index: 6, kind: input, shape index: {}]   ;;  %s1012_s7 = inlined_call_operand.vmem [shape: f32[1,32], index: 7, kind: input, shape index: {}]   ;;  %s1013_s8 = inlined_call_operand.vmem [shape: bf16[16,32], index: 8, kind: output, shape index: {}]  }
   0x1   :  { %s918_s29 = smov 0  }
   0x2 LB: > { %s30_s30 = sadd.s32 1, %s862_s28  ;;  %p767_p0 = scmp.ge.s32.totalorder %s866_s29, 1  ;;  %s866_s29 = sphi %s918_s29, %s18_s29   ;;  %s862_s28 = sphi %s916_s28, %s1015_s28   ;;  %s858_s27 = sphi %s914_s27, %s1014_s27  }
   0x3   : > { %p32_p1 = scmp.ge.s32.totalorder %s30_s30, 2  ;;  %p317_p2 = scmp.lt.s32.totalorder %s866_s29, 3 }
   0x5   : > { %s1017_s30 = smov (%p32_p1, %s30_s30), 0  ;;  %p318_p3 = pnand %p767_p0, %p317_p2 }
   0x6   : > { %s768_s9 = sshll.u32 (!%p318_p3), %s858_s27, 1  ;;  %p391_p5 = scmp.lt.s32.totalorder (!%p318_p3), %s858_s27, 1 }
   0x7   : > { %321 = sbr.rel (%p318_p3) target bundleno = 834 (0x342), region = 52  ;;  %p370_p4 = scmp.lt.s32.totalorder (!%p318_p3), %s768_s9, 3 }
   0xc   : > { %s1019_s9 = smov (!%p370_p4, %s768_s9), 3  ;;  %vm409_vm0 = vcmask 261120   ;;  %vm448_vm1 = vcmask 64512   ;;  %vm472_vm2 = vcmask 1043456   ;;  %v801_v28 = vld [vmem:[%s1009_s4 + $0x8] sm:$0xff]  ;;  %v800_v29 = vld [vmem:[%s1009_s4] sm:$0xff] }
   0xd   : > { %s769_s10 = sshll.u32 %s1019_s9, 2  ;;  %v803_v30 = vld [vmem:[%s1009_s4 + $0x18] sm:$0xff]  ;;  %v802_v31 = vld [vmem:[%s1009_s4 + $0x10] sm:$0xff]  ;;  %s1021_s27 = smov (!%p391_p5, %s858_s27), 1  ;;  %vm657_vm15 = vcmask 257024  }
   0xe   : > { %s382_s13 = scalar_lea.vmem %s1006_s1, %s769_s10  ;;  %s376_s16 = scalar_lea.vmem %s1005_s0, %s769_s10 }
   0xf   : > { %v405_v0 = vld [vmem:[%s382_s13] sm:$0xf]  ;;  %v406_v1 = vld [vmem:[%s382_s13 + $0x4] sm:$0xf]  ;;  %s388_s19 = scalar_lea.vmem %s1007_s2, %s769_s10  ;;  %s774_s10 = sshll.u32 %s1021_s27, 2 }
  0x10   : > { %v414_v2 = vsel %vm409_vm0, %v405_v0, 0  ;;  %v433_v3 = vsel %vm409_vm0, %v406_v1, 0  ;;  %v403_v4 = vld [vmem:[%s376_s16] sm:$0xf]  ;;  %v404_v5 = vld [vmem:[%s376_s16 + $0x4] sm:$0xf]  ;;  %s394_s13 = scalar_lea.vmem %s1008_s3, %s774_s10  ;;  %s400_s22 = scalar_lea.vmem %s1013_s8, %s774_s10 }
  0x11   : > { %423 = vmatpush.bf16.xpose.msra.mxu0 %v414_v2  ;;  %442 = vmatpush.bf16.xpose.msra.mxu1 %v433_v3  ;;  %v407_v12 = vld [vmem:[%s388_s19] sm:$0xf]  ;;  %v408_v14 = vld [vmem:[%s388_s19 + $0x4] sm:$0xf] }
  0x12   : > { %v474_v13 = vsel %vm472_vm2, %v407_v12, 0  ;;  %v493_v15 = vsel %vm472_vm2, %v408_v14, 0  ;;  %v614_v63 = vld [vmem:[%s394_s13] sm:$0xf] }
  0x13   : > { %483 = vmatpush.bf16.msra.mxu2 %v474_v13  ;;  %502 = vmatpush.bf16.msra.mxu3 %v493_v15  ;;  %v829_v2 = vld [vmem:[%s1010_s5] ss:$0 sm:$0xff] }
  0x17   : > { %571 = vmatpush.bf16.msrb.mxu2 %v801_v28  ;;  %599 = vmatpush.bf16.msrb.mxu3 %v803_v30 }
  0x18   : > { %776 = vmatmul.msk.bf16.vlgmr.msra.gmra.mxu0 %vm409_vm0, %v403_v4  ;;  %777 = vmatmul.msk.bf16.vlgmr.msra.gmra.mxu1 %vm409_vm0, %v404_v5 }
  0x1b   : > { %572 = vmatpush.bf16.msrb.mxu2 %v800_v29  ;;  %600 = vmatpush.bf16.msrb.mxu3 %v802_v31 }
  0x95   : > { %v425_v6 = vpop.f32.mrf.mxu0  ;;  %v444_v7 = vpop.f32.mrf.mxu1 }
  0x96   : > { %v449_v8 = vsel %vm448_vm1, %v425_v6, -inf  ;;  %v452_v9 = vsel %vm448_vm1, %v444_v7, -inf }
  0x97   : > { %450 = vmax.xlane.f32.xlu0 %v449_v8 }
  0x9d   : > { %v427_v10 = vpop.f32.mrf.mxu0  ;;  %v446_v11 = vpop.f32.mrf.mxu1 }
  0x9e   : > { %v868_v11 = vmov 32.0  }
  0x9f   : > { %453 = vmax.xlane.f32.xlu0 %v452_v9 }
 0x10a   : > { %v451_v16 = vpop.xlane.xlu0 %450 }
 0x10b   : > { %v455_v17 = vsub.f32 %v425_v6, %v451_v16  ;;  %v615_v6 = vunpack.c.l.bf16 %v614_v63 }
 0x10d   : > { %v457_v18 = vmul.f32 1.442695, %v455_v17 }
 0x10f   : > { %832 = vpow2.f32 %v457_v18 }
 0x112   : > { %v454_v19 = vpop.xlane.xlu0 %453 }
 0x113   : > { %v456_v20 = vsub.f32 %v444_v7, %v454_v19 }
 0x115   : > { %v833_v21 = vpop.eup %832  ;;  %v459_v22 = vmul.f32 1.442695, %v456_v20 }
 0x116   : > { %v461_v23 = vsel %vm448_vm1, %v833_v21, 0.0  ;;  %v467_v24 = vpack.c.bf16 %v833_v21, %v833_v21 }
 0x117   : > { %834 = vpow2.f32 %v459_v22  ;;  %462 = vadd.xlane.f32.xlu1 %v461_v23 }
 0x118   : > { %778 = vmatmul.msk.bf16.vlgmr.msra.gmra.mxu2 %vm448_vm1, %v467_v24 }
 0x11d   : > { %v835_v25 = vpop.eup %834 }
 0x11e   : > { %v464_v26 = vsel %vm448_vm1, %v835_v25, 0.0  ;;  %v468_v27 = vpack.c.bf16 %v835_v25, %v835_v25 }
 0x11f   : > { %465 = vadd.xlane.f32.xlu1 %v464_v26 }
 0x120   : > { %779 = vmatmul.msk.bf16.vlgmr.msra.gmra.mxu3 %vm448_vm1, %v468_v27 }
 0x18a   : > { %v463_v32 = vpop.xlane.xlu1 %462 }
 0x18b   : > { %836 = vrcp.f32 %v463_v32  ;;  %v519_v37 = vand.u32 2147483648, %v463_v32  ;;  %v517_v39 = vand.u32 2147483647, %v463_v32  ;;  %vm513_vm4 = vweird.f32 %v463_v32 }
 0x18d   : > { %v520_v42 = vor.u32 1.1754944e-38, %v519_v37  ;;  %vm518_vm6 = vcmp.eq.f32.partialorder %v517_v39, 8.507059e+37 }
 0x191   : > { %v837_v33 = vpop.eup %836 }
 0x192   : > { %v509_v34 = vmul.f32 %v837_v33, %v463_v32  ;;  %v466_v35 = vpop.xlane.xlu1 %465  ;;  %vm514_vm3 = vweird.f32 %v837_v33  ;;  %v830_v32 = vld [vmem:[%s1011_s6] ss:$0 sm:$0xff] }
 0x193   : > { %838 = vrcp.f32 %v466_v35  ;;  %vm515_vm5 = vmor %vm513_vm4, %vm514_vm3  ;;  %v534_v49 = vand.u32 2147483648, %v466_v35  ;;  %v532_v52 = vand.u32 2147483647, %v466_v35  ;;  %vm528_vm8 = vweird.f32 %v466_v35 }
 0x194   : > { %v510_v36 = vsub.f32 1.0, %v509_v34  ;;  %840 = vrcp.f32 %v868_v11  ;;  %v831_v34 = vld [vmem:[%s1012_s7] ss:$0 sm:$0xff] }
 0x195   : > { %v535_v54 = vor.u32 1.1754944e-38, %v534_v49  ;;  %vm533_vm10 = vcmp.eq.f32.partialorder %v532_v52, 8.507059e+37 }
 0x196   : > { %v511_v38 = vmul.f32 %v837_v33, %v510_v36 }
 0x198   : > { %v512_v40 = vadd.f32 %v837_v33, %v511_v38 }
 0x199   : > { %v839_v41 = vpop.eup %838 }
 0x19a   : > { %v524_v43 = vmul.f32 %v839_v41, %v466_v35  ;;  %v516_v44 = vsel %vm515_vm5, %v837_v33, %v512_v40  ;;  %vm529_vm7 = vweird.f32 %v839_v41  ;;  %v841_v12 = vpop.eup %840 }
 0x19b   : > { %v485_v45 = vpop.f32.mrf.mxu2  ;;  %v521_v46 = vsel %vm518_vm6, %v520_v42, %v516_v44  ;;  %vm530_vm9 = vmor %vm528_vm8, %vm529_vm7  ;;  %v621_v13 = vmul.f32 32.0, %v841_v12  ;;  %vm625_vm11 = vweird.f32 %v841_v12 }
 0x19c   : > { %v525_v47 = vsub.f32 1.0, %v524_v43  ;;  %v538_v48 = vmul.f32 %v521_v46, %v485_v45 }
 0x19d   : > { %v622_v14 = vsub.f32 1.0, %v621_v13 }
 0x19e   : > { %v526_v50 = vmul.f32 %v839_v41, %v525_v47  ;;  %v540_v51 = vpack.c.bf16 %v538_v48, %v538_v48 }
 0x19f   : > { %v623_v15 = vmul.f32 %v841_v12, %v622_v14 }
 0x1a0   : > { %788 = vmatmul.msk.bf16.vlgmr.msrb.gmra.mxu2 %vm409_vm0, %v540_v51  ;;  %v527_v53 = vadd.f32 %v839_v41, %v526_v50 }
 0x1a1   : > { %v624_v16 = vadd.f32 %v841_v12, %v623_v15 }
 0x1a2   : > { %v531_v55 = vsel %vm530_vm9, %v839_v41, %v527_v53 }
 0x1a3   : > { %v487_v56 = vpop.f32.mrf.mxu2  ;;  %v504_v57 = vpop.f32.mrf.mxu3  ;;  %v536_v58 = vsel %vm533_vm10, %v535_v54, %v531_v55  ;;  %v626_v17 = vsel %vm625_vm11, %v841_v12, %v624_v16 }
 0x1a4   : > { %v539_v59 = vmul.f32 %v536_v58, %v504_v57 }
 0x1a6   : > { %v541_v60 = vpack.c.bf16 %v539_v59, %v539_v59 }
 0x1a8   : > { %797 = vmatmul.msk.bf16.vlgmr.msrb.gmra.mxu3 %vm409_vm0, %v541_v60 }
 0x1ab   : > { %v506_v61 = vpop.f32.mrf.mxu3 }
 0x223   : > { %v574_v62 = vpop.f32.mrf.mxu2 }
 0x224   : > { %v606_v3 = vsel %vm409_vm0, %v574_v62, 0.0 }
 0x22b   : > { %v576_v0 = vpop.f32.mrf.mxu2  ;;  %v602_v1 = vpop.f32.mrf.mxu3 }
 0x22c   : > { %v607_v4 = vsel %vm409_vm0, %v602_v1, 0.0 }
 0x22d   : > { %v608_v5 = vadd.f32 %v607_v4, %v606_v3 }
 0x22f   : > { %v613_v7 = vadd.f32 %v829_v2, %v608_v5 }
 0x231   : > { %v616_v8 = vadd.f32 %v615_v6, %v613_v7 }
 0x233   : > { %v604_v9 = vpop.f32.mrf.mxu3  ;;  %v617_v10 = vsel %vm409_vm0, %v616_v8, 0.0 }
 0x234   : > { %618 = vadd.xlane.f32.xlu2 %v617_v10 }
 0x2a7   : > { %v619_v18 = vpop.xlane.xlu2 %618 }
 0x2a8   : > { %v627_v19 = vmul.f32 %v626_v17, %v619_v18 }
 0x2aa   : > { %v628_v20 = vsub.f32 %v616_v8, %v627_v19 }
 0x2ac   : > { %v629_v21 = vmul.f32 %v628_v20, %v628_v20 }
 0x2ae   : > { %v630_v22 = vsel %vm409_vm0, %v629_v21, 0.0 }
 0x2af   : > { %631 = vadd.xlane.f32.xlu2 %v630_v22 }
 0x322   : > { %v632_v23 = vpop.xlane.xlu2 %631 }
 0x323   : > { %v633_v24 = vmul.f32 %v632_v23, %v626_v17 }
 0x325   : > { %v634_v25 = vadd.f32 1e-05, %v633_v24 }
 0x327   : > { %842 = vrsqrt.f32 %v634_v25  ;;  %vm641_vm13 = vweird.f32 %v634_v25 }
 0x32d   : > { %v843_v26 = vpop.eup %842 }
 0x32e   : > { %v636_v27 = vmul.f32 %v843_v26, %v634_v25  ;;  %vm642_vm12 = vweird.f32 %v843_v26 }
 0x32f   : > { %vm643_vm14 = vmor %vm641_vm13, %vm642_vm12 }
 0x330   : > { %v637_v28 = vmul.f32 %v843_v26, %v636_v27 }
 0x332   : > { %v638_v29 = vmul.f32 0.5, %v637_v28 }
 0x334   : > { %v639_v30 = vsub.f32 1.5, %v638_v29 }
 0x336   : > { %v640_v31 = vmul.f32 %v843_v26, %v639_v30 }
 0x338   : > { %v644_v33 = vsel %vm643_vm14, %v843_v26, %v640_v31 }
 0x339   : > { %v645_v35 = vmul.f32 %v644_v33, %v628_v20 }
 0x33b   : > { %v650_v36 = vmul.f32 %v830_v32, %v645_v35 }
 0x33d   : > { %v655_v37 = vadd.f32 %v831_v34, %v650_v36 }
 0x33f   : > { %v656_v38 = vpack.c.bf16 %v655_v37, %v655_v37 }
 0x341   : > { %658 = vst.msk [vmem:[%s400_s22] sm:$0xf] %vm657_vm15, %v656_v38 }
 0x342 PF: > { %s18_s29 = sadd.s32 1, %s866_s29   ;;  %s1014_s27 = smov %s862_s28 }
 0x343   : > { %p15_p6 = scmp.ge.s32.totalorder %s18_s29, 4   ;;  %s1015_s28 = smov %s1017_s30 }
 0x345   :  { %17 = sbr.rel (!%p15_p6) target bundleno = 2 (0x2), region = 91 }

</bundles_post_ra>
